<compile_context>
chip_gen: v7x
topology: tpu7x:2x2x1
jax: 0.10.0
libtpu: 0.0.40
codegen_flags: <defaults>
</compile_context>

<pallas_src>
import jax
import jax.numpy as jnp
from jax.experimental import pallas as pl
from jax.experimental.pallas import tpu as pltpu


def _attention_block_kernel(x_ref, w1_ref, b1_ref, w2_ref, b2_ref, o_ref):
    """One (1, C, tile_p) pixel tile: channels on sublanes, pixels on lanes.

    x_ref/o_ref: (1, C, tile_p)   w1_ref: (C_mid, C)   b1_ref: (C_mid, 1)
    w2_ref: (C, C_mid)            b2_ref: (C, 1)
    """
    x = x_ref[0]                                            # (C, tile_p), native dtype
    # First 1x1 conv + ReLU (f32 accumulation on the MXU).
    h = jnp.dot(w1_ref[...], x, preferred_element_type=jnp.float32)
    h = jnp.maximum(h + b1_ref[...], 0.0)                   # (C_mid, tile_p)
    # Second 1x1 conv.
    a = jnp.dot(w2_ref[...], h, preferred_element_type=jnp.float32)
    a = a + b2_ref[...]                                     # (C, tile_p), f32
    # Single-EUP sigmoid: sigmoid(z) == 0.5*(tanh(z/2)+1).  tanh is one EUP
    # push per element vs. exp + reciprocal for jax.nn.sigmoid.
    a = 0.5 * (jnp.tanh(0.5 * a) + 1.0)
    # Gate in f32 and cast once at the store.  Cheaper than a bf16 multiply on
    # v5e (no native bf16 VALU) and matches the f32 reference math exactly.
    # Out-of-bounds lanes of a partial last pixel block flow harmlessly
    # through tanh (no FP traps on TPU) and are masked on the write-back.
    o_ref[0] = (x.astype(jnp.float32) * a).astype(o_ref.dtype)


def _round_up_128(n):
    return ((int(n) + 127) // 128) * 128


def _vmem_capacity_bytes():
    """Physical VMEM per core; falls back to the smallest generation (v7x, 64 MiB)."""
    try:
        return int(pltpu.get_tpu_info().vmem_capacity_bytes)
    except Exception:
        return 64 * 1024 * 1024


def _num_tensorcores():
    """Best-effort TensorCores-per-chip (v7x: 2).  Defaults to 1, which keeps
    the single-TC (v5e/v6e) tiling untouched."""
    try:
        info = pltpu.get_tpu_info()
        for name in ("num_cores", "num_cores_per_chip", "cores_per_chip",
                     "num_tensorcores", "tensorcores_per_chip"):
            v = getattr(info, name, None)
            if v:
                return int(v)
    except Exception:
        pass
    try:
        v = getattr(jax.devices()[0], "num_cores", None)
        if v:
            return int(v)
    except Exception:
        pass
    return 1


def _per_pixel_vmem_bytes(C, C_mid, itemsize, n_in_buf, n_out_buf):
    """VMEM bytes needed per pixel column of a tile (pipeline buffers + all
    in-kernel temporaries: f32 h, f32 attention map, f32 x-upcast/product,
    and the down-cast temporary before the store)."""
    io_tiles = (n_in_buf + n_out_buf) * C * itemsize
    temps = 4 * (C_mid + 3 * C) + C * itemsize
    return io_tiles + temps


def _weight_vmem_bytes(C, C_mid, itemsize):
    # Grid-invariant, but the pipeline may still keep two copies resident.
    return 2 * (2 * C * C_mid + C + C_mid) * itemsize


def _working_set_bytes(tile_p, C, C_mid, itemsize, n_in_buf, n_out_buf):
    return (tile_p * _per_pixel_vmem_bytes(C, C_mid, itemsize, n_in_buf, n_out_buf)
            + _weight_vmem_bytes(C, C_mid, itemsize))


def _choose_tile_p(P, B, C, C_mid, itemsize, vmem_cap, n_cores):
    """Pick pixels-per-grid-step from the per-generation VMEM budget."""
    # Size assuming the deepest pipeline we might request (3 in + 2 out bufs).
    per_px = _per_pixel_vmem_bytes(C, C_mid, itemsize, 3, 2)
    weight_bytes = _weight_vmem_bytes(C, C_mid, itemsize)
    budget = max(int(vmem_cap * 0.45) - weight_bytes, 128 * per_px)
    tile_p = budget // per_px

    # Upper clamp on the lane count, scaled so each grid step still moves at
    # least ~4 MiB of combined in+out HBM traffic (amortizes the ~0.35 us
    # fixed per-step cost even for small channel counts, e.g. C=32 f32).
    traffic_px = _round_up_128(pl.cdiv(4 << 20, max(2 * C * itemsize, 1)))
    cap = max(8192, traffic_px)
    tile_p = max(min(tile_p, cap), 128)
    tile_p = (tile_p // 128) * 128

    if B == 1 and n_cores >= 2 and P > 8 * 128:
        # Single image on a multi-TensorCore part: aim for ~8 grid steps
        # (>= 4 per core) so both cores get work and the pipeline has depth,
        # but never shrink a step below the per-step traffic floor.
        target = max(_round_up_128(pl.cdiv(P, 8)), 128)
        floor = min(traffic_px, tile_p)
        tile_p = min(tile_p, max(target, floor))

    if tile_p >= P:
        return P                              # full-extent block is always legal
    return tile_p


def _build_attention_call(B, C, C_mid, P, tile_p, dtype, vmem_limit, x_buffers):
    grid = (B, pl.cdiv(P, tile_p))

    if x_buffers is not None:
        x_spec = pl.BlockSpec((1, C, tile_p), lambda b, i: (b, 0, i),
                              pipeline_mode=pl.Buffered(x_buffers))
    else:
        x_spec = pl.BlockSpec((1, C, tile_p), lambda b, i: (b, 0, i))

    def const_spec(shape):
        return pl.BlockSpec(shape, lambda b, i: (0, 0))

    return pl.pallas_call(
        _attention_block_kernel,
        out_shape=jax.ShapeDtypeStruct((B, C, P), dtype),
        grid_spec=pltpu.PrefetchScalarGridSpec(
            num_scalar_prefetch=0,
            grid=grid,
            in_specs=[
                x_spec,                                                # x tile
                const_spec((C_mid, C)),                                # W1
                const_spec((C_mid, 1)),                                # b1
                const_spec((C, C_mid)),                                # W2
                const_spec((C, 1)),                                    # b2
            ],
            out_specs=pl.BlockSpec((1, C, tile_p), lambda b, i: (b, 0, i)),
        ),
        compiler_params=pltpu.CompilerParams(
            dimension_semantics=("parallel", "parallel"),
            vmem_limit_bytes=vmem_limit,
        ),
    )


def attention_block_pallas(x_nchw, w1, b1, w2, b2):
    """AttentionBlock forward.

    x_nchw: (B, C, H, W).  Weights follow PyTorch Conv2d layout with the 1x1
    spatial dims squeezed: w1: (C//8, C), b1: (C//8,), w2: (C, C//8), b2: (C,).
    """
    B, C, H, W = x_nchw.shape
    C_mid = w1.shape[0]
    P = H * W

    # Order-preserving collapse of the spatial dims (no transpose, no pad).
    x3 = x_nchw.reshape(B, C, P)
    b1_2d = b1.reshape(C_mid, 1)
    b2_2d = b2.reshape(C, 1)

    itemsize = jnp.dtype(x_nchw.dtype).itemsize
    vmem_cap = _vmem_capacity_bytes()
    n_cores = _num_tensorcores()
    tile_p = _choose_tile_p(P, B, C, C_mid, itemsize, vmem_cap, n_cores)

    # 3-deep pipelining on the streaming input only when VMEM headroom allows
    # (always on v5e/v6e's 128 MiB, conditionally on v7x's 64 MiB).
    deep_ok = (hasattr(pl, "Buffered")
               and _working_set_bytes(tile_p, C, C_mid, itemsize, 3, 2) + (8 << 20)
               <= int(0.8 * vmem_cap))
    n_in_buf = 3 if deep_ok else 2
    working = _working_set_bytes(tile_p, C, C_mid, itemsize, n_in_buf, 2)
    vmem_limit = int(min(max(working + (8 << 20), 32 << 20), vmem_cap - (4 << 20)))

    args = (x3, w1, b1_2d, w2, b2_2d)
    try:
        out3 = _build_attention_call(B, C, C_mid, P, tile_p, x_nchw.dtype,
                                     vmem_limit, 3 if deep_ok else None)(*args)
    except Exception:
        # Conservative fallback: default double-buffering and a halved pixel
        # tile -- strictly LESS VMEM than the first attempt, so a VMEM-limit
        # failure is recoverable.  If the fallback would be identical to what
        # already failed, re-raise instead of masking the error.
        if tile_p <= 128:
            fb_tile = tile_p
        else:
            fb_tile = max(128, ((tile_p // 2) // 128) * 128)
            if fb_tile >= P:
                fb_tile = P
        if not deep_ok and fb_tile == tile_p:
            raise
        out3 = _build_attention_call(B, C, C_mid, P, fb_tile, x_nchw.dtype,
                                     vmem_limit, None)(*args)

    return out3.reshape(B, C, H, W)


def attention_block_reference(x_nchw, w1, b1, w2, b2):
    """Plain-JAX NCHW reference mirroring the PyTorch AttentionBlock."""
    h = jnp.einsum("mc,bchw->bmhw", w1, x_nchw) + b1[None, :, None, None]
    h = jnp.maximum(h, 0.0)
    a = jnp.einsum("cm,bmhw->bchw", w2, h) + b2[None, :, None, None]
    return x_nchw * jax.nn.sigmoid(a)


if __name__ == "__main__":
    # Small shapes consistent with the module (in_channels must be >= 8 so that
    # in_channels // 8 >= 1): B=2, C=32, H=W=16.
    B, C, H, W = 2, 32, 16, 16
    C_mid = C // 8

    key = jax.random.PRNGKey(0)
    kx, k1, kb1, k2, kb2 = jax.random.split(key, 5)

    x = jax.random.normal(kx, (B, C, H, W), dtype=jnp.float32)
    # PyTorch Conv2d weight layout (out_channels, in_channels), 1x1 squeezed.
    w1 = jax.random.normal(k1, (C_mid, C), dtype=jnp.float32) * 0.1
    b1 = jax.random.normal(kb1, (C_mid,), dtype=jnp.float32) * 0.1
    w2 = jax.random.normal(k2, (C, C_mid), dtype=jnp.float32) * 0.1
    b2 = jax.random.normal(kb2, (C,), dtype=jnp.float32) * 0.1

    out = attention_block_pallas(x, w1, b1, w2, b2)
    out = jax.block_until_ready(out)

    ref = attention_block_reference(x, w1, b1, w2, b2)
    assert out.shape == (B, C, H, W)
    assert jnp.allclose(out, ref, atol=1e-5, rtol=1e-5), "mismatch vs reference"

    print("KERNEL_OK")
</pallas_src>

<mosaic_0001>
module attributes {stable_mosaic.version = 11 : i64} {
  func.func @_attention_block_kernel(%arg0: i32, %arg1: i32, %arg2: memref<1x32x128xf32, #tpu.memory_space<vmem>>, %arg3: memref<4x32xf32, #tpu.memory_space<vmem>>, %arg4: memref<4x1xf32, #tpu.memory_space<vmem>>, %arg5: memref<32x4xf32, #tpu.memory_space<vmem>>, %arg6: memref<32x1xf32, #tpu.memory_space<vmem>>, %arg7: memref<1x32x128xf32, #tpu.memory_space<vmem>>) attributes {dimension_semantics = [#tpu.dimension_semantics<parallel>, #tpu.dimension_semantics<parallel>], iteration_bounds = array<i64: 2, 2>, scalar_prefetch = 0 : i64, scratch_operands = 0 : i64, tpu.core_type = #tpu.core_type<tc>, window_params = [{transform_indices = @transform_0, window_bounds = array<i64: 1, 32, 128>}, {pipeline_mode = #tpu.pipeline_mode<synchronous>, transform_indices = @transform_1, window_bounds = array<i64: 4, 32>}, {pipeline_mode = #tpu.pipeline_mode<synchronous>, transform_indices = @transform_2, window_bounds = array<i64: 4, 1>}, {pipeline_mode = #tpu.pipeline_mode<synchronous>, transform_indices = @transform_3, window_bounds = array<i64: 32, 4>}, {pipeline_mode = #tpu.pipeline_mode<synchronous>, transform_indices = @transform_4, window_bounds = array<i64: 32, 1>}, {transform_indices = @transform_5, window_bounds = array<i64: 1, 32, 128>}]} {
    %c0 = arith.constant 0 : index
    %c0_0 = arith.constant 0 : index
    %c0_1 = arith.constant 0 : index
    %0 = vector.load %arg2[%c0, %c0_0, %c0_1] : memref<1x32x128xf32, #tpu.memory_space<vmem>>, vector<1x32x128xf32>
    %1 = vector.shape_cast %0 : vector<1x32x128xf32> to vector<32x128xf32>
    %c0_2 = arith.constant 0 : index
    %c0_3 = arith.constant 0 : index
    %2 = vector.load %arg3[%c0_2, %c0_3] : memref<4x32xf32, #tpu.memory_space<vmem>>, vector<4x32xf32>
    %cst = arith.constant dense<0.000000e+00> : vector<4x128xf32>
    %3 = tpu.matmul %2, %1, %cst {dimension_numbers = #tpu.dot_dimension_numbers<[1], [0], [0], [1], [0, 0, 1, 1], [], []>} : vector<4x32xf32>, vector<32x128xf32>, vector<4x128xf32> -> vector<4x128xf32>
    %c0_4 = arith.constant 0 : index
    %c0_5 = arith.constant 0 : index
    %4 = vector.load %arg4[%c0_4, %c0_5] : memref<4x1xf32, #tpu.memory_space<vmem>>, vector<4x1xf32>
    %5 = vector.broadcast %4 : vector<4x1xf32> to vector<4x128xf32>
    %6 = arith.addf %3, %5 : vector<4x128xf32>
    %cst_6 = arith.constant 0.000000e+00 : f32
    %7 = vector.broadcast %cst_6 : f32 to vector<4x128xf32>
    %8 = arith.maximumf %6, %7 : vector<4x128xf32>
    %c0_7 = arith.constant 0 : index
    %c0_8 = arith.constant 0 : index
    %9 = vector.load %arg5[%c0_7, %c0_8] : memref<32x4xf32, #tpu.memory_space<vmem>>, vector<32x4xf32>
    %cst_9 = arith.constant dense<0.000000e+00> : vector<32x128xf32>
    %10 = tpu.matmul %9, %8, %cst_9 {dimension_numbers = #tpu.dot_dimension_numbers<[1], [0], [0], [1], [0, 0, 1, 1], [], []>} : vector<32x4xf32>, vector<4x128xf32>, vector<32x128xf32> -> vector<32x128xf32>
    %c0_10 = arith.constant 0 : index
    %c0_11 = arith.constant 0 : index
    %11 = vector.load %arg6[%c0_10, %c0_11] : memref<32x1xf32, #tpu.memory_space<vmem>>, vector<32x1xf32>
    %12 = vector.broadcast %11 : vector<32x1xf32> to vector<32x128xf32>
    %13 = arith.addf %10, %12 : vector<32x128xf32>
    %cst_12 = arith.constant 5.000000e-01 : f32
    %14 = vector.broadcast %cst_12 : f32 to vector<32x128xf32>
    %15 = arith.mulf %14, %13 : vector<32x128xf32>
    %16 = math.tanh %15 : vector<32x128xf32>
    %cst_13 = arith.constant 1.000000e+00 : f32
    %17 = vector.broadcast %cst_13 : f32 to vector<32x128xf32>
    %18 = arith.addf %16, %17 : vector<32x128xf32>
    %cst_14 = arith.constant 5.000000e-01 : f32
    %19 = vector.broadcast %cst_14 : f32 to vector<32x128xf32>
    %20 = arith.mulf %19, %18 : vector<32x128xf32>
    %21 = arith.mulf %1, %20 : vector<32x128xf32>
    %c0_15 = arith.constant 0 : index
    %c0_16 = arith.constant 0 : index
    %c0_17 = arith.constant 0 : index
    %22 = vector.load %arg7[%c0_15, %c0_16, %c0_17] : memref<1x32x128xf32, #tpu.memory_space<vmem>>, vector<1x32x128xf32>
    %23 = vector.shape_cast %22 : vector<1x32x128xf32> to vector<32x128xf32>
    %24 = vector.shape_cast %21 : vector<32x128xf32> to vector<1x32x128xf32>
    tpu.vector_store %arg7[%c0_15, %c0_16, %c0_17], %24 {strides = array<i32>} : memref<1x32x128xf32, #tpu.memory_space<vmem>>, vector<1x32x128xf32>,
    return
  }
  func.func @transform_0(%arg0: i32, %arg1: i32) -> (i32, i32, i32) {
    %c0_i32 = arith.constant 0 : i32
    %c0_i32_0 = arith.constant 0 : i32
    return %arg0, %c0_i32, %arg1 : i32, i32, i32
  }
  func.func @transform_1(%arg0: i32, %arg1: i32) -> (i32, i32) {
    %c0_i32 = arith.constant 0 : i32
    %c0_i32_0 = arith.constant 0 : i32
    %c0_i32_1 = arith.constant 0 : i32
    return %c0_i32, %c0_i32_0 : i32, i32
  }
  func.func @transform_2(%arg0: i32, %arg1: i32) -> (i32, i32) {
    %c0_i32 = arith.constant 0 : i32
    %c0_i32_0 = arith.constant 0 : i32
    %c0_i32_1 = arith.constant 0 : i32
    return %c0_i32, %c0_i32_0 : i32, i32
  }
  func.func @transform_3(%arg0: i32, %arg1: i32) -> (i32, i32) {
    %c0_i32 = arith.constant 0 : i32
    %c0_i32_0 = arith.constant 0 : i32
    %c0_i32_1 = arith.constant 0 : i32
    return %c0_i32, %c0_i32_0 : i32, i32
  }
  func.func @transform_4(%arg0: i32, %arg1: i32) -> (i32, i32) {
    %c0_i32 = arith.constant 0 : i32
    %c0_i32_0 = arith.constant 0 : i32
    %c0_i32_1 = arith.constant 0 : i32
    return %c0_i32, %c0_i32_0 : i32, i32
  }
  func.func @transform_5(%arg0: i32, %arg1: i32) -> (i32, i32, i32) {
    %c0_i32 = arith.constant 0 : i32
    %c0_i32_0 = arith.constant 0 : i32
    return %arg0, %c0_i32, %arg1 : i32, i32, i32
  }
}

</mosaic_0001>

<bundles_post_ra>
// kernel: tpu_custom_call.1
= control target key start
LH: loop header
LB: loop body
LE: loop exit
PB: predicated region body
PF: predicated region fallthrough
CT: control target
= control target key end

     0   :  { %10 = vsyncpa [#allocation3], 0  ;;  %s1178_s0 = inlined_call_operand.hbm [shape: f32[2,32,256], index: 0, kind: input, shape index: {}]   ;;  %s1179_s1 = inlined_call_operand.vmem [shape: f32[4,32], index: 1, kind: input, shape index: {}]   ;;  %s1180_s2 = inlined_call_operand.vmem [shape: f32[4,1], index: 2, kind: input, shape index: {}]   ;;  %s1181_s3 = inlined_call_operand.vmem [shape: f32[32,4], index: 3, kind: input, shape index: {}]   ;;  %s1182_s4 = inlined_call_operand.vmem [shape: f32[32,1], index: 4, kind: input, shape index: {}]   ;;  %s1183_s5 = inlined_call_operand.hbm [shape: f32[2,32,256], index: 5, kind: output, shape index: {}]  }
   0x1   :  { %12 = vsyncpa [#allocation3 + $0x1], 0 }
   0x2   :  { %13 = vsyncpa [#allocation4], 0 }
   0x3   :  { %15 = vsyncpa [#allocation4 + $0x1], 0  ;;  %s929_s18 = smov 0   ;;  %s931_s19 = smov 0  }
   0x4   :  { %s933_s20 = smov 0   ;;  %s935_s21 = smov 0  }
   0x5   :  { %s937_s22 = smov 0   ;;  %s939_s23 = smov 0  }
   0x6   :  { %s941_s24 = smov 0   ;;  %s943_s25 = smov 0  }
   0x7 LB: > { %1188 = sst [smem:[#allocation8_spill]] %s857_s18  ;;  %s603_s26 = sadd.s32 4294967295, %s885_s25   ;;  %s885_s25 = sphi %s943_s25, %s21_s25   ;;  %s881_s24 = sphi %s941_s24, %s1207_s24   ;;  %s877_s23 = sphi %s939_s23, %s1206_s23   ;;  %s873_s22 = sphi %s937_s22, %s1205_s22   ;;  %s869_s21 = sphi %s935_s21, %s1204_s21   ;;  %s865_s20 = sphi %s933_s20, %s1203_s20   ;;  %s861_s19 = sphi %s931_s19, %s1202_s19   ;;  %s857_s18 = sphi %s929_s18, %s1201_s18  }
   0x8   : > { %s604_s27 = sadd.s32 4294967294, %s885_s25   ;;  %s30_s28 = sadd.s32 1, %s877_s23 }
   0x9   : > { %s33_s29 = sadd.s32 1, %s881_s24  ;;  %p31_p0 = scmp.ge.s32.totalorder %s30_s28, 2 }
   0xa   : > { %s42_s30 = sadd.s32 1, %s865_s20  ;;  %p49_p1 = scmp.ne.s32.totalorder %s865_s20, %s861_s19 }
   0xb   : > { %p50_p2 = scmp.eq.s32.totalorder %s885_s25, 0  ;;  %s1209_s28 = smov (%p31_p0, %s30_s28), 0 }
   0xc   : > { %1189 = sst [smem:[#allocation9_spill]] %s1209_s28  ;;  %s1211_s29 = smov (!%p31_p0, %s33_s29), %s881_s24 }
   0xd   : > { %s38_s6 = ssub.s32 %s877_s23, %s1209_s28  ;;  %p982_p3 = por %p50_p2, %p49_p1 }
   0xe   : > { %p35_p4 = scmp.ge.s32.totalorder %s1211_s29, 2  ;;  %p55_p5 = scmp.ne.s32.totalorder %s861_s19, %s857_s18 }
   0xf   : > { %p56_p6 = scmp.eq.s32.totalorder %s603_s26, 0  ;;  %p165_p7 = scmp.eq.s32.totalorder %s603_s26, 3 }
  0x10   : > { %s1213_s29 = smov (%p35_p4, %s1211_s29), 0  ;;  %p171_p10 = scmp.eq.s32.totalorder %s604_s27, 3 }
  0x11   : > { %1191 = sst [smem:[#allocation10_spill]] %s1213_s29  ;;  %p990_p8 = por %p56_p6, %p55_p5 }
  0x12   : > { %p994_p9 = por %p165_p7, %p49_p1  ;;  %s37_s10 = ssub.s32 %s881_s24, %s1213_s29 }
  0x13   : > { %s39_s11 = sor.u32 %s38_s6, %s37_s10  ;;  %p1000_p12 = por %p171_p10, %p55_p5 }
  0x14   : > { %s1193_s9 = scalar_select %p994_p9, 1, 0 }
  0x15   : > { %p40_p11 = scmp.eq.s32.totalorder %s39_s11, 0  ;;  %p671_p13 = scmp.lt.s32.totalorder %s885_s25, 4 }
  0x16   : > { %s1194_s12 = scalar_select %p1000_p12, 1, 0 }
  0x17   : > { %s203_s13 = sand.u32 1, %s865_s20   ;;  %s608_s16 = sshll.u32 %s881_s24, 3 }
  0x18   : > { %s1007_s14 = scalar_select %p40_p11, %s865_s20, %s42_s30  }
  0x19   : > { %s607_s15 = sshll.u32 %s203_s13, 5  ;;  %s212_s17 = sadd.s32 %s877_s23, %s608_s16 }
  0x1a   : > { %s207_s26 = scalar_lea.vmem [#allocation2], %s607_s15  ;;  %s609_s18 = sshll.u32 %s212_s17, 7 }
  0x1b   : > { %s215_s28 = sshll.u32 %s207_s26, 4  ;;  %s1016_s6 = scalar_lea.hbm %s1178_s0, %s609_s18  ;;  %s1011_s28 = int_to_ptr.vmem [resolvable:$true] %s215_s28 }
  0x1c   : > { %p1020_p0 = pnand %p671_p13, %p982_p3  ;;  %s1024_s10 = scalar_lea.sflag [#allocation3], %s203_s13 }
  0x1d   : > { %s757_s11 = scalar_lea.hbm %s1016_s6, 512  ;;  %s762_s7 = scalar_lea.hbm %s1178_s0, 2048 }
  0x1e   : > { %p758_p1 = scmp.ne.s32.totalorder %s1016_s6, %s757_s11  ;;  %p759_p2 = pneg %p1020_p0 }
  0x1f   : > { %p763_p3 = scmp.lt.u32.totalorder %s1016_s6, %s1178_s0  ;;  %p764_p6 = scmp.lt.u32.totalorder %s762_s7, %s757_s11 }
  0x20   : > { %p760_p4 = pnand %p759_p2, %p758_p1  ;;  %p766_p10 = scmp.lt.u32.totalorder %s757_s11, %s1016_s6 }
  0x21   : > { %p765_p7 = por %p764_p6, %p763_p3 }
  0x22   : > { %p761_p5 = pneg %p760_p4 }
  0x23   : > { %p767_p11 = por %p766_p10, %p765_p7 }
  0x25   : > { %p768_p13 = pnand %p767_p11, %p761_p5 }
  0x27   : > { %771 = shalt.err (!%p768_p13)
}
  0x28   : > { %s772_s13 = scalar_lea.vmem %s1011_s28, 512  ;;  %s887_s17 = smov [#allocation2]  }
  0x29   : > { %p773_p1 = scmp.ne.s32.totalorder %s1011_s28, %s772_s13  ;;  %s777_s26 = sshll.u32 %s887_s17, 4  ;;  %s778_s26 = int_to_ptr.vmem [resolvable:$false] %s777_s26 }
  0x2a   : > { %s779_s27 = scalar_lea.vmem %s778_s26, 1024  ;;  %p780_p9 = scmp.lt.s32.totalorder %s1011_s28, %s778_s26 }
  0x2b   : > { %p775_p4 = pnand %p773_p1, %p759_p2  ;;  %p781_p3 = scmp.lt.s32.totalorder %s779_s27, %s772_s13 }
  0x2d   : > { %p776_p12 = pneg %p775_p4  ;;  %p782_p6 = por %p781_p3, %p780_p9 }
  0x2f   : > { %p783_p7 = pnand %p782_p6, %p776_p12 }
  0x31   : > { %786 = shalt.err (!%p783_p7)
}
  0x32   : > { %s888_s11 = smov 256   ;;  %s889_s18 = smov 128  }
  0x33   : > { %s890_s29 = smov 8   ;;  %p610_p2 = scmp.ge.s32.totalorder %s885_s25, 1 }
  0x34   : > { %666 = dma.hbm_to_vmem [thread:$0]  (!%p1020_p0), %s1016_s6, 512, %s1011_s28, %s1024_s10, %s888_s11, %s889_s18, %s890_s29  }
  0x35   : > { %p223_p5 = scmp.lt.s32.totalorder %s885_s25, 5 }
  0x37   : > { %p224_p10 = pnand %p610_p2, %p223_p5 }
  0x38   : > { %s1055_s7 = sand.u32 (!%p224_p10), 1, %s861_s19  }
  0x39   : > { %227 = sbr.rel (%p224_p10) target bundleno = 548 (0x224), region = 40  ;;  %s611_s15 = sshll.u32 (!%p224_p10), %s1055_s7, 5 }
  0x3a   : > { %s230_s16 = scalar_lea.sflag (!%p224_p10), [#allocation3], %s1055_s7  ;;  %s233_s13 = scalar_lea.vmem (!%p224_p10), [#allocation2], %s611_s15 }
  0x40   : > { %848 = dma.done.wait (%p990_p8), %s230_s16, 512  }
  0x41   : > { %850 = vsyncadd (%p990_p8), %s230_s16, 4294966784  ;;  %v891_v0 = vmov 0.0|0.0   ;;  %vm892_vm0 = vmmov 0   ;;  %v893_v1 = vmov 0.0   ;;  %v894_v2 = vmov 0   ;;  %v1065_v3 = vld [vmem:[%s233_s13] sm:$0xff] }
  0x42   : > { %653 = vmatprep.subr.bf16.mxu0 %v891_v0  ;;  %642 = vmatprep.mubr.msk.f32.mxu0 %vm892_vm0, %v893_v1  ;;  %v1067_v4 = vld [vmem:[%s233_s13 + $0x8] sm:$0xff]  ;;  %v1069_v5 = vld [vmem:[%s233_s13 + $0x10] sm:$0xff]  ;;  %v1073_v7 = vld [vmem:[%s233_s13 + $0x18] sm:$0xff]  ;;  %vm271_vm1 = vcmask 261120   ;;  %vm374_vm2 = vcmask 31744   ;;  %vm387_vm3 = vcmask 1043456  }
  0x43   : > { %747 = vset.pattern.permute.xlu0 %v894_v2  ;;  %748 = vset.pattern.permute.xlu1 %v894_v2  ;;  %v654_v6 = vpack.c.bf16 %v1067_v4, %v1065_v3  ;;  %v265_v8 = vld [vmem:[%s1180_s2] sm:$0xf]  ;;  %v657_v9 = vpack.c.bf16 %v1073_v7, %v1069_v5  ;;  %v353_v12 = vld [vmem:[%s1182_s4 + $0x18] sm:$0xff]  ;;  %v351_v14 = vld [vmem:[%s1182_s4 + $0x8] sm:$0xff]  ;;  %s620_s27 = sshll.u32 %s873_s22, 3  ;;  %s259_s18 = scalar_lea.vmem [#allocation5], %s611_s15 }
  0x44   : > { %268 = vperm.xlu0 %747, %v265_v8   ;;  %v350_v10 = vld [vmem:[%s1182_s4] sm:$0xff]  ;;  %361 = vperm.xlu1 %748, %v351_v14   ;;  %v352_v15 = vld [vmem:[%s1182_s4 + $0x10] sm:$0xff]  ;;  %v347_v21 = vld [vmem:[%s1181_s3 + $0x8] sm:$0xff]  ;;  %s512_s11 = sadd.s32 %s869_s21, %s620_s27  ;;  %s515_s29 = sshll.u32 %s259_s18, 4  ;;  %s1117_s29 = int_to_ptr.vmem [resolvable:$true] %s515_s29 }
  0x45   : > { %655 = vmatpush3.bf16.msra.mxu0 %v654_v6  ;;  %v264_v11 = vld [vmem:[%s1179_s1] sm:$0xf]  ;;  %v348_v22 = vld [vmem:[%s1181_s3 + $0x10] sm:$0xff]  ;;  %v349_v23 = vld [vmem:[%s1181_s3 + $0x18] sm:$0xff]  ;;  %s621_s22 = sshll.u32 %s512_s11, 7  ;;  %s501_s13 = scalar_lea.sflag [#allocation4], %s1055_s7 }
  0x46   : > { %656 = vmatprep.subr.bf16.mxu0 %v891_v0  ;;  %v346_v13 = vld [vmem:[%s1181_s3] sm:$0xff]  ;;  %s1123_s16 = scalar_lea.hbm %s1183_s5, %s621_s22  ;;  %s787_s28 = scalar_lea.vmem %s1117_s29, 512 }
  0x47   : > { %647 = vmatprep.mubr.msk.f32.mxu1 %vm374_vm2, %v346_v13  ;;  %p788_p8 = scmp.ne.s32.totalorder %s1117_s29, %s787_s28  ;;  %p1196_p9 = scmp.ne.s32.totalorder %s1193_s9, 0 }
  0x48   : > { %356 = vperm.xlu0 %747, %v350_v10   ;;  %366 = vperm.xlu1 %748, %v352_v15   ;;  %s895_s8 = smov [#allocation5]  }
  0x49   : > { %658 = vmatpush3.bf16.msra.mxu0 %v657_v9  ;;  %p789_p12 = pnand %p788_p8, %p1196_p9  ;;  %s791_s6 = sshll.u32 %s895_s8, 4  ;;  %s792_s6 = int_to_ptr.vmem [resolvable:$false] %s791_s6 }
  0x4a   : > { %s793_s30 = scalar_lea.vmem %s792_s6, 1024  ;;  %p794_p11 = scmp.lt.s32.totalorder %s1117_s29, %s792_s6 }
  0x4b   : > { %p790_p0 = pneg %p789_p12  ;;  %p795_p13 = scmp.lt.s32.totalorder %s793_s30, %s787_s28 }
  0x4c   : > { %643 = vmatmul.mubr.msk.f32.vlgmr.msra.gmra.mrb[0].mxu0 %vm271_vm1, %v264_v11  ;;  %371 = vperm.xlu0 %747, %v353_v12  }
  0x4d   : > { %p796_p1 = por %p795_p13, %p794_p11 }
  0x4f   : > { %p797_p4 = pnand %p796_p1, %p790_p0 }
  0xc3   : > { %v269_v16 = vpop.permute.xlu0 %268  ;;  %v362_v25 = vpop.permute.xlu1 %361 }
  0xc7   : > { %v357_v24 = vpop.permute.xlu0 %356  ;;  %v367_v34 = vpop.permute.xlu1 %366 }
  0xcb   : > { %v372_v31 = vpop.permute.xlu0 %371 }
 0x11f   : > { %v341_v17 = vpop.f32.mrb[0].mxu0 }
 0x120   : > { %v342_v18 = vadd.f32 %v341_v17, %v269_v16  ;;  %v644_v19 = vpop.f32.mrb[1].mxu0 }
 0x122   : > { %v345_v20 = vmax.f32 %v342_v18, 0.0 }
 0x124   : > { %645 = vmatprep.subr.msk.mxu1 %vm387_vm3, %v345_v20 }
 0x125   : > { %646 = vmatpush3.msk.msra.mxu1 %vm387_vm3, %v345_v20 }
 0x126   : > { %648 = vmatmul.mubr.msk.f32.vlgmr.msra.gmra.mrb[0].mxu1 %vm374_vm2, %v347_v21 }
 0x127   : > { %650 = vmatprep.mubr.msk.f32.mxu1 %vm374_vm2, %v348_v22 }
 0x12a   : > { %651 = vmatmul.mubr.msk.f32.gmra.mrb[2].mxu1 %vm374_vm2, %v349_v23 }
 0x1f9   : > { %v649_v26 = vpop.f32.mrb[0].mxu1 }
 0x1fa   : > { %v463_v27 = vadd.f32 %v649_v26, %v362_v25  ;;  %v457_v28 = vpop.f32.mrb[1].mxu1 }
 0x1fb   : > { %v458_v29 = vadd.f32 %v457_v28, %v357_v24 }
 0x1fc   : > { %v477_v30 = vmul.f32 0.5, %v463_v27 }
 0x1fd   : > { %v476_v32 = vmul.f32 0.5, %v458_v29  ;;  %v652_v33 = vpop.f32.mrb[2].mxu1 }
 0x1fe   : > { %749 = vtanh.f32 %v477_v30  ;;  %v473_v35 = vadd.f32 %v652_v33, %v372_v31  ;;  %v467_v36 = vpop.f32.mrb[3].mxu1 }
 0x1ff   : > { %751 = vtanh.f32 %v476_v32  ;;  %v468_v37 = vadd.f32 %v467_v36, %v367_v34 }
 0x200   : > { %v479_v38 = vmul.f32 0.5, %v473_v35 }
 0x201   : > { %v478_v39 = vmul.f32 0.5, %v468_v37 }
 0x202   : > { %753 = vtanh.f32 %v479_v38 }
 0x203   : > { %755 = vtanh.f32 %v478_v39 }
 0x208   : > { %v750_v40 = vpop.eup %749 }
 0x209   : > { %v752_v41 = vpop.eup %751  ;;  %v485_v42 = vadd.f32 1.0, %v750_v40 }
 0x20a   : > { %v484_v43 = vadd.f32 1.0, %v752_v41 }
 0x20b   : > { %v489_v44 = vmul.f32 0.5, %v485_v42 }
 0x20c   : > { %v754_v45 = vpop.eup %753  ;;  %v488_v46 = vmul.f32 0.5, %v484_v43 }
 0x20d   : > { %v756_v47 = vpop.eup %755  ;;  %v493_v48 = vmul.f32 %v489_v44, %v1067_v4  ;;  %v487_v49 = vadd.f32 1.0, %v754_v45 }
 0x20e   : > { %v492_v50 = vmul.f32 %v488_v46, %v1065_v3  ;;  %v486_v51 = vadd.f32 1.0, %v756_v47 }
 0x20f   : > { %497 = vst [vmem:[%s259_s18 + $0x8] sm:$0xff] %v493_v48  ;;  %v491_v52 = vmul.f32 0.5, %v487_v49 }
 0x210   : > { %496 = vst [vmem:[%s259_s18] sm:$0xff] %v492_v50  ;;  %v490_v53 = vmul.f32 0.5, %v486_v51 }
 0x211   : > { %v495_v54 = vmul.f32 %v491_v52, %v1073_v7 }
 0x212   : > { %v494_v55 = vmul.f32 %v490_v53, %v1069_v5 }
 0x213   : > { %499 = vst [vmem:[%s259_s18 + $0x18] sm:$0xff] %v495_v54 }
 0x214   : > { %498 = vst [vmem:[%s259_s18 + $0x10] sm:$0xff] %v494_v55 }
 0x215   : > { %800 = shalt.err (!%p797_p4)
}
 0x216   : > { %s801_s10 = scalar_lea.hbm %s1123_s16, 512  ;;  %s805_s27 = scalar_lea.hbm %s1183_s5, 2048 }
 0x217   : > { %p802_p3 = scmp.ne.s32.totalorder %s1123_s16, %s801_s10  ;;  %p806_p2 = scmp.lt.u32.totalorder %s1123_s16, %s1183_s5 }
 0x218   : > { %p807_p5 = scmp.lt.u32.totalorder %s805_s27, %s801_s10  ;;  %p809_p8 = scmp.lt.u32.totalorder %s801_s10, %s1123_s16 }
 0x219   : > { %p803_p6 = pnand %p802_p3, %p1196_p9 }
 0x21a   : > { %p808_p10 = por %p807_p5, %p806_p2 }
 0x21b   : > { %p804_p7 = pneg %p803_p6 }
 0x21c   : > { %p810_p12 = por %p809_p8, %p808_p10 }
 0x21e   : > { %p811_p0 = pnand %p810_p12, %p804_p7 }
 0x220   : > { %814 = shalt.err (!%p811_p0)
}
 0x221   : > { %s896_s22 = smov 128   ;;  %s897_s21 = smov 256  }
 0x222   : > { %s898_s15 = smov 8  }
 0x223   : > { %661 = dma.vmem_to_hbm [thread:$0]  (%p1196_p9), %s1117_s29, 512, %s1123_s16, %s501_s13, %s896_s22, %s897_s21, %s898_s15  }
 0x224 PF: > { %s1197_s28 = sld [smem:[#allocation8_spill]]  ;;  %p672_p11 = scmp.ge.s32.totalorder %s885_s25, 2 }
 0x225   : > { %p1198_p13 = scmp.ne.s32.totalorder %s1194_s12, 0 }
 0x227   : > { %p668_p1 = pnand %p672_p11, %p1198_p13 }
 0x22a   : > { %s530_s8 = sand.u32 1, %s1197_s28  }
 0x22b   : > { %s531_s6 = scalar_lea.sflag [#allocation4], %s530_s8 }
 0x22c   : > { %852 = dma.done.wait (!%p668_p1), %s531_s6, 512  }
 0x22d   : > { %854 = vsyncadd (!%p668_p1), %s531_s6, 4294966784  ;;  %s21_s25 = sadd.s32 1, %s885_s25   ;;  %s1199_s9 = sld [smem:[#allocation9_spill]] }
 0x22e   : > { %p18_p4 = scmp.ge.s32.totalorder %s21_s25, 6   ;;  %s1200_s7 = sld [smem:[#allocation10_spill]] }
 0x22f   : > { %s1201_s18 = smov %s861_s19  ;;  %s1202_s19 = smov %s865_s20 }
 0x230   : > { %s1203_s20 = smov %s1007_s14  ;;  %s1204_s21 = smov %s877_s23 }
 0x231   : > { %s1205_s22 = smov %s881_s24  ;;  %20 = sbr.rel (!%p18_p4) target bundleno = 7 (0x7), region = 85 }
 0x233   : > { %s1206_s23 = smov %s1199_s9 }
 0x234   : > { %s1207_s24 = smov %s1200_s7 }
 0x238   :  { %536 = vsyncpa [#allocation3], 1 }
 0x239   :  { %538 = vsyncpa [#allocation3 + $0x1], 1 }
 0x23a   :  { %539 = vsyncpa [#allocation4], 1 }
 0x23b   :  { %541 = vsyncpa [#allocation4 + $0x1], 1 }

</bundles_post_ra>
